<compile_context>
chip_gen: v6e
topology: v6e:2x2x1
jax: 0.10.0
libtpu: 0.0.40
codegen_flags: <defaults>
</compile_context>

<pallas_src>
import functools

import jax
import jax.numpy as jnp
from jax.experimental import pallas as pl
from jax.experimental.pallas import tpu as pltpu


def _round_up(x, m):
    return ((x + m - 1) // m) * m


# ----------------------------- Pallas kernel ---------------------------------
def _make_value_kernel(n_cat, use_bf16=False):
    mxu_dtype = jnp.bfloat16 if use_bf16 else jnp.float32

    def kernel(x_ref, *refs):
        # refs layout: t_0..t_{n_cat-1}, w1, b1, w2, b2, w3, b3, out
        t_refs = refs[:n_cat]
        w1_ref, b1_ref, w2_ref, b2_ref, w3_ref, b3_ref, o_ref = refs[n_cat:]

        x = x_ref[...]                                   # (bb, n_cat + n_num) f32
        bb = x.shape[0]

        # Numeric-feature contribution.  Categorical id columns of `x` hit rows of
        # w1 that were zeroed at setup, so they contribute nothing here.
        h = jnp.dot(x.astype(mxu_dtype), w1_ref[...].astype(mxu_dtype),
                    preferred_element_type=jnp.float32)  # (bb, H_pad)

        # Fused embedding @ W1 contribution: one-hot(id) @ T_c == gather of T_c rows.
        # Vectorized, MXU-driven, no scalar gather loop.
        for c in range(n_cat):
            t_ref = t_refs[c]
            vocab_pad = t_ref.shape[0]
            ids = x[:, c:c + 1].astype(jnp.int32)                         # (bb, 1)
            iota = jax.lax.broadcasted_iota(jnp.int32, (bb, vocab_pad), 1)
            onehot = (iota == ids).astype(mxu_dtype)                      # (bb, vocab_pad)
            h = h + jnp.dot(onehot, t_ref[...].astype(mxu_dtype),
                            preferred_element_type=jnp.float32)

        # Bias / ReLU in f32 (v5e VPU has no bf16 path).
        h = jnp.maximum(h + b1_ref[...], 0.0)
        h = jnp.maximum(
            jnp.dot(h.astype(mxu_dtype), w2_ref[...].astype(mxu_dtype),
                    preferred_element_type=jnp.float32) + b2_ref[...], 0.0)
        out = jnp.dot(h.astype(mxu_dtype), w3_ref[...].astype(mxu_dtype),
                      preferred_element_type=jnp.float32) + b3_ref[...]   # (bb, 128)
        o_ref[...] = out.astype(o_ref.dtype)

    return kernel


# ----------------------------- Forward wrapper --------------------------------
def value_network_forward(state, kparams, n_cat, block_b=256, use_bf16=False):
    """Mirrors ValueNetwork.forward; `state` is [B, n_cat + n_num] float32."""
    B, d_state = state.shape
    t_tables = kparams["t_tables"]
    out_pad = kparams["w3"].shape[1]

    # Batch tiling: lane-dense 128-wide output blocks, sublane-aligned row blocks.
    bb = min(block_b, _round_up(B, 8))
    b_pad = _round_up(B, bb)
    x = jnp.pad(state, ((0, b_pad - B), (0, 0)))

    weights = list(t_tables) + [kparams["w1"], kparams["b1"], kparams["w2"],
                                kparams["b2"], kparams["w3"], kparams["b3"]]
    const_spec = lambda a: pl.BlockSpec(a.shape, lambda i: (0, 0))  # resident weights

    out = pl.pallas_call(
        _make_value_kernel(n_cat, use_bf16=use_bf16),
        out_shape=jax.ShapeDtypeStruct((b_pad, out_pad), jnp.float32),
        grid_spec=pltpu.PrefetchScalarGridSpec(
            num_scalar_prefetch=0,
            grid=(b_pad // bb,),
            in_specs=[pl.BlockSpec((bb, d_state), lambda i: (i, 0))]
                     + [const_spec(w) for w in weights],
            out_specs=pl.BlockSpec((bb, out_pad), lambda i: (i, 0)),
        ),
        compiler_params=pltpu.CompilerParams(
            dimension_semantics=("parallel",)),   # shards batch across TCs on v7x
    )(x, *weights)
    return out[:B, :1]


# --------------------------- Param setup / padding -----------------------------
def init_params(key, vocab_sizes, emb_dim, n_num, hidden_dim, init_w=0.003):
    """PyTorch-convention init; linears stored as (in, out) for y = x @ W + b."""
    n_cat = len(vocab_sizes)
    state_dim = n_cat * emb_dim + n_num
    keys = jax.random.split(key, 8 + n_cat)

    emb_tables = [
        jax.random.normal(keys[i], (vocab_sizes[i], emb_dim), jnp.float32) * 0.1
        for i in range(n_cat)
    ]

    def linear_init(kw, kb, fan_in, fan_out):
        bound = 1.0 / jnp.sqrt(jnp.float32(fan_in))
        w = jax.random.uniform(kw, (fan_out, fan_in), jnp.float32, -bound, bound)
        b = jax.random.uniform(kb, (fan_out,), jnp.float32, -bound, bound)
        return w.T, b.reshape(1, fan_out)

    w1, b1 = linear_init(keys[n_cat + 0], keys[n_cat + 1], state_dim, hidden_dim)
    w2, b2 = linear_init(keys[n_cat + 2], keys[n_cat + 3], hidden_dim, hidden_dim)
    w3 = jax.random.uniform(keys[n_cat + 4], (1, hidden_dim), jnp.float32, -init_w, init_w).T
    b3 = jax.random.uniform(keys[n_cat + 5], (1,), jnp.float32, -init_w, init_w).reshape(1, 1)

    return {
        "emb_tables": emb_tables,
        "w1": w1, "b1": b1,
        "w2": w2, "b2": b2,
        "w3": w3, "b3": b3,
    }, state_dim


def prepare_kernel_params(params, vocab_sizes, emb_dim, n_num, out_pad=128):
    """Fold the embedding layer into layer 1 and zero-pad everything lane-dense."""
    n_cat = len(vocab_sizes)
    w1 = params["w1"]                                  # (n_cat*emb_dim + n_num, hidden)
    hidden = w1.shape[1]
    h_pad = _round_up(hidden, 128)

    # T_c = E_c @ W1[rows_for_cat_c]  -> (vocab_c, hidden), padded (vocab_pad, h_pad).
    t_tables = []
    for c in range(n_cat):
        rows = w1[c * emb_dim:(c + 1) * emb_dim, :]
        t = params["emb_tables"][c] @ rows
        vocab_pad = _round_up(vocab_sizes[c], 8)
        t_tables.append(jnp.pad(t, ((0, vocab_pad - vocab_sizes[c]),
                                    (0, h_pad - hidden))))

    # W1 applied to the RAW state: zero rows for categorical id columns.
    w1_num = w1[n_cat * emb_dim:, :]                   # (n_num, hidden)
    w1_state = jnp.concatenate(
        [jnp.zeros((n_cat, hidden), jnp.float32), w1_num], axis=0)
    w1_state = jnp.pad(w1_state, ((0, 0), (0, h_pad - hidden)))

    b1 = jnp.pad(params["b1"], ((0, 0), (0, h_pad - hidden)))
    w2 = jnp.pad(params["w2"], ((0, h_pad - hidden), (0, h_pad - hidden)))
    b2 = jnp.pad(params["b2"], ((0, 0), (0, h_pad - hidden)))
    w3 = jnp.pad(params["w3"], ((0, h_pad - hidden), (0, out_pad - 1)))
    b3 = jnp.pad(params["b3"], ((0, 0), (0, out_pad - 1)))

    return {
        "t_tables": t_tables,
        "w1": w1_state, "b1": b1,
        "w2": w2, "b2": b2,
        "w3": w3, "b3": b3,
    }


# ------------------------------ Pure-JAX reference -----------------------------
def value_network_forward_ref(state, params, n_cat):
    cat_tensor = state[:, :n_cat].astype(jnp.int32)
    num_tensor = state[:, n_cat:]
    embs = [params["emb_tables"][c][cat_tensor[:, c]] for c in range(n_cat)]
    x = jnp.concatenate(embs + [num_tensor], axis=1)
    x = jnp.maximum(x @ params["w1"] + params["b1"], 0.0)
    x = jnp.maximum(x @ params["w2"] + params["b2"], 0.0)
    return x @ params["w3"] + params["b3"]


# ----------------------------------- Main --------------------------------------
if __name__ == "__main__":
    key = jax.random.PRNGKey(0)
    k_state_cat, k_state_num, k_params = jax.random.split(key, 3)

    # small synthetic config
    batch = 8
    vocab_sizes = (7, 5, 11)        # 3 categorical columns
    emb_dim = 4
    n_num = 5
    hidden_dim = 32
    n_cat = len(vocab_sizes)

    params, state_dim = init_params(k_params, vocab_sizes, emb_dim, n_num, hidden_dim)
    kparams = prepare_kernel_params(params, vocab_sizes, emb_dim, n_num)

    # build `state`: first n_cat columns are integer category ids (as floats),
    # remaining n_num columns are real-valued features.
    cat_cols = jnp.stack(
        [
            jax.random.randint(jax.random.fold_in(k_state_cat, c), (batch,), 0, vocab_sizes[c])
            for c in range(n_cat)
        ],
        axis=1,
    ).astype(jnp.float32)
    num_cols = jax.random.normal(k_state_num, (batch, n_num), jnp.float32)
    state = jnp.concatenate([cat_cols, num_cols], axis=1)   # [B, n_cat + n_num]

    fwd = jax.jit(functools.partial(value_network_forward, n_cat=n_cat))
    out = fwd(state, kparams)
    out = jax.block_until_ready(out)

    ref = value_network_forward_ref(state, params, n_cat)
    assert out.shape == (batch, 1)
    assert jnp.allclose(out, ref, atol=1e-5, rtol=1e-5), "Pallas output mismatch vs reference"

    print("KERNEL_OK")
</pallas_src>

<mosaic_0001>
module attributes {stable_mosaic.version = 11 : i64} {
  func.func @kernel(%arg0: i32, %arg1: memref<8x8xf32, #tpu.memory_space<vmem>>, %arg2: memref<8x128xf32, #tpu.memory_space<vmem>>, %arg3: memref<8x128xf32, #tpu.memory_space<vmem>>, %arg4: memref<16x128xf32, #tpu.memory_space<vmem>>, %arg5: memref<8x128xf32, #tpu.memory_space<vmem>>, %arg6: memref<1x128xf32, #tpu.memory_space<vmem>>, %arg7: memref<128x128xf32, #tpu.memory_space<vmem>>, %arg8: memref<1x128xf32, #tpu.memory_space<vmem>>, %arg9: memref<128x128xf32, #tpu.memory_space<vmem>>, %arg10: memref<1x128xf32, #tpu.memory_space<vmem>>, %arg11: memref<8x128xf32, #tpu.memory_space<vmem>>) attributes {dimension_semantics = [#tpu.dimension_semantics<parallel>], iteration_bounds = array<i64: 1>, scalar_prefetch = 0 : i64, scratch_operands = 0 : i64, tpu.core_type = #tpu.core_type<tc>, window_params = [{transform_indices = @transform_0, window_bounds = array<i64: 8, 8>}, {pipeline_mode = #tpu.pipeline_mode<synchronous>, transform_indices = @transform_1, window_bounds = array<i64: 8, 128>}, {pipeline_mode = #tpu.pipeline_mode<synchronous>, transform_indices = @transform_2, window_bounds = array<i64: 8, 128>}, {pipeline_mode = #tpu.pipeline_mode<synchronous>, transform_indices = @transform_3, window_bounds = array<i64: 16, 128>}, {pipeline_mode = #tpu.pipeline_mode<synchronous>, transform_indices = @transform_4, window_bounds = array<i64: 8, 128>}, {pipeline_mode = #tpu.pipeline_mode<synchronous>, transform_indices = @transform_5, window_bounds = array<i64: 1, 128>}, {pipeline_mode = #tpu.pipeline_mode<synchronous>, transform_indices = @transform_6, window_bounds = array<i64: 128, 128>}, {pipeline_mode = #tpu.pipeline_mode<synchronous>, transform_indices = @transform_7, window_bounds = array<i64: 1, 128>}, {pipeline_mode = #tpu.pipeline_mode<synchronous>, transform_indices = @transform_8, window_bounds = array<i64: 128, 128>}, {pipeline_mode = #tpu.pipeline_mode<synchronous>, transform_indices = @transform_9, window_bounds = array<i64: 1, 128>}, {transform_indices = @transform_10, window_bounds = array<i64: 8, 128>}]} {
    %c0 = arith.constant 0 : index
    %c0_0 = arith.constant 0 : index
    %0 = vector.load %arg1[%c0, %c0_0] : memref<8x8xf32, #tpu.memory_space<vmem>>, vector<8x8xf32>
    %c0_1 = arith.constant 0 : index
    %c0_2 = arith.constant 0 : index
    %1 = vector.load %arg5[%c0_1, %c0_2] : memref<8x128xf32, #tpu.memory_space<vmem>>, vector<8x128xf32>
    %cst = arith.constant dense<0.000000e+00> : vector<8x128xf32>
    %2 = tpu.matmul %0, %1, %cst {dimension_numbers = #tpu.dot_dimension_numbers<[1], [0], [0], [1], [0, 0, 1, 1], [], []>} : vector<8x8xf32>, vector<8x128xf32>, vector<8x128xf32> -> vector<8x128xf32>
    %3 = vector.extract_strided_slice %0 {offsets = [0, 0], sizes = [8, 1], strides = [1, 1]} : vector<8x8xf32> to vector<8x1xf32>
    %4 = arith.fptosi %3 : vector<8x1xf32> to vector<8x1xi32>
    %5 = tpu.iota {dimensions = array<i32: 1>} : vector<8x8xi32>
    %6 = vector.broadcast %4 : vector<8x1xi32> to vector<8x8xi32>
    %7 = arith.cmpi eq, %5, %6 : vector<8x8xi32>
    %8 = arith.extui %7 : vector<8x8xi1> to vector<8x8xi32>
    %9 = arith.sitofp %8 : vector<8x8xi32> to vector<8x8xf32>
    %c0_3 = arith.constant 0 : index
    %c0_4 = arith.constant 0 : index
    %10 = vector.load %arg2[%c0_3, %c0_4] : memref<8x128xf32, #tpu.memory_space<vmem>>, vector<8x128xf32>
    %cst_5 = arith.constant dense<0.000000e+00> : vector<8x128xf32>
    %11 = tpu.matmul %9, %10, %cst_5 {dimension_numbers = #tpu.dot_dimension_numbers<[1], [0], [0], [1], [0, 0, 1, 1], [], []>} : vector<8x8xf32>, vector<8x128xf32>, vector<8x128xf32> -> vector<8x128xf32>
    %12 = arith.addf %2, %11 : vector<8x128xf32>
    %13 = vector.extract_strided_slice %0 {offsets = [0, 1], sizes = [8, 1], strides = [1, 1]} : vector<8x8xf32> to vector<8x1xf32>
    %14 = arith.fptosi %13 : vector<8x1xf32> to vector<8x1xi32>
    %15 = tpu.iota {dimensions = array<i32: 1>} : vector<8x8xi32>
    %16 = vector.broadcast %14 : vector<8x1xi32> to vector<8x8xi32>
    %17 = arith.cmpi eq, %15, %16 : vector<8x8xi32>
    %18 = arith.extui %17 : vector<8x8xi1> to vector<8x8xi32>
    %19 = arith.sitofp %18 : vector<8x8xi32> to vector<8x8xf32>
    %c0_6 = arith.constant 0 : index
    %c0_7 = arith.constant 0 : index
    %20 = vector.load %arg3[%c0_6, %c0_7] : memref<8x128xf32, #tpu.memory_space<vmem>>, vector<8x128xf32>
    %cst_8 = arith.constant dense<0.000000e+00> : vector<8x128xf32>
    %21 = tpu.matmul %19, %20, %cst_8 {dimension_numbers = #tpu.dot_dimension_numbers<[1], [0], [0], [1], [0, 0, 1, 1], [], []>} : vector<8x8xf32>, vector<8x128xf32>, vector<8x128xf32> -> vector<8x128xf32>
    %22 = arith.addf %12, %21 : vector<8x128xf32>
    %23 = vector.extract_strided_slice %0 {offsets = [0, 2], sizes = [8, 1], strides = [1, 1]} : vector<8x8xf32> to vector<8x1xf32>
    %24 = arith.fptosi %23 : vector<8x1xf32> to vector<8x1xi32>
    %25 = tpu.iota {dimensions = array<i32: 1>} : vector<8x16xi32>
    %26 = vector.broadcast %24 : vector<8x1xi32> to vector<8x16xi32>
    %27 = arith.cmpi eq, %25, %26 : vector<8x16xi32>
    %28 = arith.extui %27 : vector<8x16xi1> to vector<8x16xi32>
    %29 = arith.sitofp %28 : vector<8x16xi32> to vector<8x16xf32>
    %c0_9 = arith.constant 0 : index
    %c0_10 = arith.constant 0 : index
    %30 = vector.load %arg4[%c0_9, %c0_10] : memref<16x128xf32, #tpu.memory_space<vmem>>, vector<16x128xf32>
    %cst_11 = arith.constant dense<0.000000e+00> : vector<8x128xf32>
    %31 = tpu.matmul %29, %30, %cst_11 {dimension_numbers = #tpu.dot_dimension_numbers<[1], [0], [0], [1], [0, 0, 1, 1], [], []>} : vector<8x16xf32>, vector<16x128xf32>, vector<8x128xf32> -> vector<8x128xf32>
    %32 = arith.addf %22, %31 : vector<8x128xf32>
    %c0_12 = arith.constant 0 : index
    %c0_13 = arith.constant 0 : index
    %33 = vector.load %arg6[%c0_12, %c0_13] : memref<1x128xf32, #tpu.memory_space<vmem>>, vector<1x128xf32>
    %34 = vector.broadcast %33 : vector<1x128xf32> to vector<8x128xf32>
    %35 = arith.addf %32, %34 : vector<8x128xf32>
    %cst_14 = arith.constant 0.000000e+00 : f32
    %36 = vector.broadcast %cst_14 : f32 to vector<8x128xf32>
    %37 = arith.maximumf %35, %36 : vector<8x128xf32>
    %c0_15 = arith.constant 0 : index
    %c0_16 = arith.constant 0 : index
    %38 = vector.load %arg7[%c0_15, %c0_16] : memref<128x128xf32, #tpu.memory_space<vmem>>, vector<128x128xf32>
    %cst_17 = arith.constant dense<0.000000e+00> : vector<8x128xf32>
    %39 = tpu.matmul %37, %38, %cst_17 {dimension_numbers = #tpu.dot_dimension_numbers<[1], [0], [0], [1], [0, 0, 1, 1], [], []>} : vector<8x128xf32>, vector<128x128xf32>, vector<8x128xf32> -> vector<8x128xf32>
    %c0_18 = arith.constant 0 : index
    %c0_19 = arith.constant 0 : index
    %40 = vector.load %arg8[%c0_18, %c0_19] : memref<1x128xf32, #tpu.memory_space<vmem>>, vector<1x128xf32>
    %41 = vector.broadcast %40 : vector<1x128xf32> to vector<8x128xf32>
    %42 = arith.addf %39, %41 : vector<8x128xf32>
    %cst_20 = arith.constant 0.000000e+00 : f32
    %43 = vector.broadcast %cst_20 : f32 to vector<8x128xf32>
    %44 = arith.maximumf %42, %43 : vector<8x128xf32>
    %c0_21 = arith.constant 0 : index
    %c0_22 = arith.constant 0 : index
    %45 = vector.load %arg9[%c0_21, %c0_22] : memref<128x128xf32, #tpu.memory_space<vmem>>, vector<128x128xf32>
    %cst_23 = arith.constant dense<0.000000e+00> : vector<8x128xf32>
    %46 = tpu.matmul %44, %45, %cst_23 {dimension_numbers = #tpu.dot_dimension_numbers<[1], [0], [0], [1], [0, 0, 1, 1], [], []>} : vector<8x128xf32>, vector<128x128xf32>, vector<8x128xf32> -> vector<8x128xf32>
    %c0_24 = arith.constant 0 : index
    %c0_25 = arith.constant 0 : index
    %47 = vector.load %arg10[%c0_24, %c0_25] : memref<1x128xf32, #tpu.memory_space<vmem>>, vector<1x128xf32>
    %48 = vector.broadcast %47 : vector<1x128xf32> to vector<8x128xf32>
    %49 = arith.addf %46, %48 : vector<8x128xf32>
    %c0_26 = arith.constant 0 : index
    %c0_27 = arith.constant 0 : index
    %50 = vector.load %arg11[%c0_26, %c0_27] : memref<8x128xf32, #tpu.memory_space<vmem>>, vector<8x128xf32>
    tpu.vector_store %arg11[%c0_26, %c0_27], %49 {strides = array<i32>} : memref<8x128xf32, #tpu.memory_space<vmem>>, vector<8x128xf32>,
    return
  }
  func.func @transform_0(%arg0: i32) -> (i32, i32) {
    %c0_i32 = arith.constant 0 : i32
    %c0_i32_0 = arith.constant 0 : i32
    return %arg0, %c0_i32 : i32, i32
  }
  func.func @transform_1(%arg0: i32) -> (i32, i32) {
    %c0_i32 = arith.constant 0 : i32
    %c0_i32_0 = arith.constant 0 : i32
    %c0_i32_1 = arith.constant 0 : i32
    return %c0_i32, %c0_i32_0 : i32, i32
  }
  func.func @transform_2(%arg0: i32) -> (i32, i32) {
    %c0_i32 = arith.constant 0 : i32
    %c0_i32_0 = arith.constant 0 : i32
    %c0_i32_1 = arith.constant 0 : i32
    return %c0_i32, %c0_i32_0 : i32, i32
  }
  func.func @transform_3(%arg0: i32) -> (i32, i32) {
    %c0_i32 = arith.constant 0 : i32
    %c0_i32_0 = arith.constant 0 : i32
    %c0_i32_1 = arith.constant 0 : i32
    return %c0_i32, %c0_i32_0 : i32, i32
  }
  func.func @transform_4(%arg0: i32) -> (i32, i32) {
    %c0_i32 = arith.constant 0 : i32
    %c0_i32_0 = arith.constant 0 : i32
    %c0_i32_1 = arith.constant 0 : i32
    return %c0_i32, %c0_i32_0 : i32, i32
  }
  func.func @transform_5(%arg0: i32) -> (i32, i32) {
    %c0_i32 = arith.constant 0 : i32
    %c0_i32_0 = arith.constant 0 : i32
    %c0_i32_1 = arith.constant 0 : i32
    return %c0_i32, %c0_i32_0 : i32, i32
  }
  func.func @transform_6(%arg0: i32) -> (i32, i32) {
    %c0_i32 = arith.constant 0 : i32
    %c0_i32_0 = arith.constant 0 : i32
    %c0_i32_1 = arith.constant 0 : i32
    return %c0_i32, %c0_i32_0 : i32, i32
  }
  func.func @transform_7(%arg0: i32) -> (i32, i32) {
    %c0_i32 = arith.constant 0 : i32
    %c0_i32_0 = arith.constant 0 : i32
    %c0_i32_1 = arith.constant 0 : i32
    return %c0_i32, %c0_i32_0 : i32, i32
  }
  func.func @transform_8(%arg0: i32) -> (i32, i32) {
    %c0_i32 = arith.constant 0 : i32
    %c0_i32_0 = arith.constant 0 : i32
    %c0_i32_1 = arith.constant 0 : i32
    return %c0_i32, %c0_i32_0 : i32, i32
  }
  func.func @transform_9(%arg0: i32) -> (i32, i32) {
    %c0_i32 = arith.constant 0 : i32
    %c0_i32_0 = arith.constant 0 : i32
    %c0_i32_1 = arith.constant 0 : i32
    return %c0_i32, %c0_i32_0 : i32, i32
  }
  func.func @transform_10(%arg0: i32) -> (i32, i32) {
    %c0_i32 = arith.constant 0 : i32
    %c0_i32_0 = arith.constant 0 : i32
    return %arg0, %c0_i32 : i32, i32
  }
}

</mosaic_0001>

<bundles_post_ra>
// kernel: value_network_forward.1
= control target key start
LH: loop header
LB: loop body
LE: loop exit
PB: predicated region body
PF: predicated region fallthrough
CT: control target
= control target key end

     0   :  { %15 = vsyncpa [#allocation3], 0  ;;  %s1160_s0 = inlined_call_operand.hbm [shape: f32[8,8], index: 0, kind: input, shape index: {}]   ;;  %s1161_s1 = inlined_call_operand.hbm [shape: f32[8,128], index: 1, kind: input, shape index: {}]   ;;  %s1162_s2 = inlined_call_operand.vmem [shape: f32[8,128], index: 2, kind: input, shape index: {}]   ;;  %s1163_s3 = inlined_call_operand.hbm [shape: f32[16,128], index: 3, kind: input, shape index: {}]   ;;  %s1164_s4 = inlined_call_operand.hbm [shape: f32[8,128], index: 4, kind: input, shape index: {}]   ;;  %s1165_s5 = inlined_call_operand.vmem [shape: f32[1,128], index: 5, kind: input, shape index: {}]   ;;  %s1166_s6 = inlined_call_operand.hbm [shape: f32[128,128], index: 6, kind: input, shape index: {}]   ;;  %s1167_s7 = inlined_call_operand.hbm [shape: f32[1,128], index: 7, kind: input, shape index: {}]   ;;  %s1168_s8 = inlined_call_operand.hbm [shape: f32[128,128], index: 8, kind: input, shape index: {}]   ;;  %s1169_s9 = inlined_call_operand.hbm [shape: f32[1,128], index: 9, kind: input, shape index: {}]   ;;  %s1170_s10 = inlined_call_operand.vmem [shape: f32[8,128], index: 10, kind: output, shape index: {}]  }
   0x1   :  { %16 = vsyncpa [#allocation5], 0 }
   0x2   :  { %17 = vsyncpa [#allocation8], 0 }
   0x3   :  { %18 = vsyncpa [#allocation11], 0 }
   0x4   :  { %19 = vsyncpa [#allocation14], 0  ;;  %s999_s13 = smov [#allocation4]   ;;  %s1000_s15 = smov [#allocation7]  }
   0x5   :  { %s36_s14 = sshll.u32 %s999_s13, 4  ;;  %s60_s16 = sshll.u32 %s1000_s15, 4  ;;  %s37_s14 = int_to_ptr.vmem [resolvable:$true] %s36_s14  ;;  %s61_s16 = int_to_ptr.vmem [resolvable:$true] %s60_s16 }
   0x6   :  { %s837_s17 = scalar_lea.vmem %s37_s14, 128  ;;  %p842_p1 = scmp.lt.s32.totalorder %s37_s14, %s37_s14 }
   0x7   :  { %p838_p0 = scmp.ne.s32.totalorder %s37_s14, %s837_s17  ;;  %p843_p2 = scmp.lt.s32.totalorder %s837_s17, %s837_s17 }
   0x9   :  { %p844_p3 = por %p843_p2, %p842_p1 }
   0xb   :  { %p845_p4 = pnand %p844_p3, %p838_p0 }
   0xd   :  { %848 = shalt.err (!%p845_p4)
}
   0xe   :  { %39 = dma.hbm_to_vmem [thread:$0]  %s1161_s1, 128, %s37_s14, [#allocation5]  }
   0xf   :  { %s857_s20 = scalar_lea.vmem %s61_s16, 128  ;;  %p862_p6 = scmp.lt.s32.totalorder %s61_s16, %s61_s16 }
  0x10   :  { %p858_p5 = scmp.ne.s32.totalorder %s61_s16, %s857_s20  ;;  %p863_p7 = scmp.lt.s32.totalorder %s857_s20, %s857_s20 }
  0x12   :  { %p864_p8 = por %p863_p7, %p862_p6 }
  0x14   :  { %p865_p9 = pnand %p864_p8, %p858_p5 }
  0x16   :  { %868 = shalt.err (!%p865_p9)
}
  0x17   :  { %63 = dma.hbm_to_vmem [thread:$0]  %s1164_s4, 128, %s61_s16, [#allocation8]  }
  0x18   :  { %s1001_s23 = smov [#allocation10]   ;;  %s1002_s25 = smov [#allocation2]  }
  0x19   :  { %s84_s24 = sshll.u32 %s1001_s23, 4  ;;  %s26_s26 = sshll.u32 %s1002_s25, 4  ;;  %s85_s24 = int_to_ptr.vmem [resolvable:$true] %s84_s24  ;;  %s27_s26 = int_to_ptr.vmem [resolvable:$true] %s26_s26 }
  0x1a   :  { %s877_s27 = scalar_lea.vmem %s85_s24, 16  ;;  %s881_s1 = scalar_lea.vmem %s85_s24, 32 }
  0x1b   :  { %p878_p10 = scmp.ne.s32.totalorder %s85_s24, %s877_s27  ;;  %p882_p11 = scmp.lt.s32.totalorder %s85_s24, %s85_s24 }
  0x1c   :  { %p883_p12 = scmp.lt.s32.totalorder %s881_s1, %s877_s27 }
  0x1e   :  { %p884_p13 = por %p883_p12, %p882_p11 }
  0x20   :  { %p885_p0 = pnand %p884_p13, %p878_p10 }
  0x22   :  { %888 = shalt.err (!%p885_p0)
}
  0x23   :  { %87 = dma.hbm_to_vmem [thread:$0]  %s1167_s7, 16, %s85_s24, [#allocation11]  }
  0x24   :  { %s897_s30 = scalar_lea.vmem %s27_s26, 128  ;;  %p902_p2 = scmp.lt.s32.totalorder %s27_s26, %s27_s26 }
  0x25   :  { %p898_p1 = scmp.ne.s32.totalorder %s27_s26, %s897_s30  ;;  %p903_p3 = scmp.lt.s32.totalorder %s897_s30, %s897_s30 }
  0x27   :  { %p904_p4 = por %p903_p3, %p902_p2 }
  0x29   :  { %p905_p5 = pnand %p904_p4, %p898_p1 }
  0x2b   :  { %908 = shalt.err (!%p905_p5)
}
  0x2c   :  { %29 = dma.hbm_to_vmem [thread:$0]  %s1160_s0, 128, %s27_s26, [#allocation3]  }
  0x2d   :  { %s1003_s12 = smov [#allocation6]  }
  0x2e   :  { %s47_s13 = sshll.u32 %s1003_s12, 4  ;;  %s48_s13 = int_to_ptr.vmem [resolvable:$true] %s47_s13 }
  0x2f   :  { %s917_s14 = scalar_lea.vmem %s48_s13, 256  ;;  %p922_p7 = scmp.lt.s32.totalorder %s48_s13, %s48_s13 }
  0x30   :  { %p918_p6 = scmp.ne.s32.totalorder %s48_s13, %s917_s14  ;;  %p923_p8 = scmp.lt.s32.totalorder %s917_s14, %s917_s14 }
  0x32   :  { %p924_p9 = por %p923_p8, %p922_p7 }
  0x34   :  { %p925_p10 = pnand %p924_p9, %p918_p6 }
  0x36   :  { %928 = shalt.err (!%p925_p10)
}
  0x37   :  { %s1004_s7 = smov 128   ;;  %s1005_s15 = smov 8  }
  0x38   :  { %53 = dma.hbm_to_vmem [thread:$0]  %s1163_s3, 256, %s48_s13, [#allocation5], %s1004_s7, %s1004_s7, %s1005_s15  }
  0x39   :  { %s1006_s18 = smov [#allocation9]   ;;  %s1007_s0 = smov [#allocation12]  }
  0x3a   :  { %s71_s19 = sshll.u32 %s1006_s18, 4  ;;  %s93_s20 = sshll.u32 %s1007_s0, 4  ;;  %s72_s19 = int_to_ptr.vmem [resolvable:$true] %s71_s19  ;;  %s94_s20 = int_to_ptr.vmem [resolvable:$true] %s93_s20 }
  0x3b   :  { %s937_s21 = scalar_lea.vmem %s72_s19, 2048  ;;  %p942_p12 = scmp.lt.s32.totalorder %s72_s19, %s72_s19 }
  0x3c   :  { %p938_p11 = scmp.ne.s32.totalorder %s72_s19, %s937_s21  ;;  %p943_p13 = scmp.lt.s32.totalorder %s937_s21, %s937_s21 }
  0x3e   :  { %p944_p0 = por %p943_p13, %p942_p12 }
  0x40   :  { %p945_p1 = pnand %p944_p0, %p938_p11 }
  0x42   :  { %948 = shalt.err (!%p945_p1)
}
  0x43   :  { %77 = dma.hbm_to_vmem [thread:$0]  %s1166_s6, 2048, %s72_s19, [#allocation8], %s1004_s7, %s1004_s7, %s1005_s15  }
  0x44   :  { %s957_s24 = scalar_lea.vmem %s94_s20, 2048  ;;  %p962_p3 = scmp.lt.s32.totalorder %s94_s20, %s94_s20 }
  0x45   :  { %p958_p2 = scmp.ne.s32.totalorder %s94_s20, %s957_s24  ;;  %p963_p4 = scmp.lt.s32.totalorder %s957_s24, %s957_s24 }
  0x47   :  { %p964_p5 = por %p963_p4, %p962_p3 }
  0x49   :  { %p965_p6 = pnand %p964_p5, %p958_p2 }
  0x4b   :  { %968 = shalt.err (!%p965_p6)
}
  0x4c   :  { %99 = dma.hbm_to_vmem [thread:$0]  %s1168_s8, 2048, %s94_s20, [#allocation11], %s1004_s7, %s1004_s7, %s1005_s15  }
  0x4d   :  { %s1008_s26 = smov [#allocation13]  }
  0x4e   :  { %s106_s27 = sshll.u32 %s1008_s26, 4  ;;  %s107_s27 = int_to_ptr.vmem [resolvable:$true] %s106_s27 }
  0x4f   :  { %s977_s1 = scalar_lea.vmem %s107_s27, 16  ;;  %s981_s28 = scalar_lea.vmem %s107_s27, 32 }
  0x50   :  { %p978_p7 = scmp.ne.s32.totalorder %s107_s27, %s977_s1  ;;  %p982_p8 = scmp.lt.s32.totalorder %s107_s27, %s107_s27 }
  0x51   :  { %p983_p9 = scmp.lt.s32.totalorder %s981_s28, %s977_s1 }
  0x53   :  { %p984_p10 = por %p983_p9, %p982_p8 }
  0x55   :  { %p985_p11 = pnand %p984_p10, %p978_p7 }
  0x57   :  { %988 = shalt.err (!%p985_p11)
}
  0x58   :  { %109 = dma.hbm_to_vmem [thread:$0]  %s1169_s9, 16, %s107_s27, [#allocation14]  }
  0x59   :  { %989 = dma.done.wait [#allocation3], 128  }
  0x5a   :  { %990 = vsyncadd [#allocation3], 4294967168 }
  0x5b   :  { %991 = dma.done.wait [#allocation5], 384  }
  0x5c   :  { %992 = vsyncadd [#allocation5], 4294966912 }
  0x5d   :  { %993 = dma.done.wait [#allocation8], 2176  }
  0x5e   :  { %994 = vsyncadd [#allocation8], 4294965120 }
  0x5f   :  { %995 = dma.done.wait [#allocation11], 2064  }
  0x60   :  { %996 = vsyncadd [#allocation11], 4294965232 }
  0x61   :  { %997 = dma.done.wait [#allocation14], 16  }
  0x62   :  { %998 = vsyncadd [#allocation14], 4294967280  ;;  %v1009_v0 = vmov 0   ;;  %v1010_v1 = vmov 2   ;;  %v1011_v2 = vmov 0.0   ;;  %v134_v3 = vld [vmem:[#allocation2] sm:$0xff]  ;;  %v137_v11 = vlaneseq }
  0x63   :  { %825 = vset.pattern.permute.xlu0 %v1009_v0  ;;  %827 = vset.pattern.permute.xlu1 %v1010_v1  ;;  %v808_v4 = vtrunc.f32 %v134_v3  ;;  %v145_v5 = vld [vmem:[#allocation4] sm:$0xff]  ;;  %v135_v6 = vld [vmem:[#allocation7] sm:$0xff]  ;;  %vm1012_vm0 = vmmov 0   ;;  %vm146_vm1 = vcmask 64512   ;;  %v381_v8 = vld [vmem:[#allocation6 + $0x8] sm:$0xff]  ;;  %v1013_v10 = vmov 1  }
  0x64   :  { %716 = vmatprep.subr.mxu0 %v1011_v2  ;;  %721 = vmatprep.subr.mxu1 %v1011_v2  ;;  %v380_v9 = vld [vmem:[#allocation6] sm:$0xff]  ;;  %v138_v12 = vand.u32 127, %v137_v11  ;;  %vm382_vm2 = vcmask 130048   ;;  %v299_v15 = vld [vmem:[%s1162_s2] sm:$0xff]  ;;  %v480_v21 = vld [vmem:[#allocation9 + $0x70] sm:$0xff] }
  0x65   :  { %717 = vmatpush3.msra.mxu0 %v145_v5  ;;  %718 = vmatprep.mubr.msk.f32.mxu0 %vm1012_vm0, %v1011_v2  ;;  %v809_v7 = vcvt.f32.s32 %v808_v4  ;;  %v481_v19 = vld [vmem:[#allocation9 + $0x78] sm:$0xff]  ;;  %v479_v22 = vld [vmem:[#allocation9 + $0x68] sm:$0xff]  ;;  %v478_v23 = vld [vmem:[#allocation9 + $0x60] sm:$0xff] }
  0x66   :  { %722 = vmatpush3.msra.mxu1 %v135_v6  ;;  %723 = vmatprep.mubr.msk.f32.mxu1 %vm1012_vm0, %v1011_v2  ;;  %v477_v24 = vld [vmem:[#allocation9 + $0x58] sm:$0xff]  ;;  %v476_v25 = vld [vmem:[#allocation9 + $0x50] sm:$0xff]  ;;  %v475_v26 = vld [vmem:[#allocation9 + $0x48] sm:$0xff] }
  0x67   :  { %724 = vmatmul.mubr.msk.f32.vlgmr.msra.gmra.mxu1 %vm146_vm1, %v134_v3  ;;  %726 = vmatprep.subr.mxu0 %v1011_v2  ;;  %v474_v27 = vld [vmem:[#allocation9 + $0x40] sm:$0xff]  ;;  %v473_v28 = vld [vmem:[#allocation9 + $0x38] sm:$0xff]  ;;  %v472_v29 = vld [vmem:[#allocation9 + $0x30] sm:$0xff] }
  0x68   :  { %140 = vperm.xlu0 %825, %v809_v7   ;;  %375 = vperm.xlu1 %827, %v809_v7   ;;  %v471_v31 = vld [vmem:[#allocation9 + $0x28] sm:$0xff]  ;;  %v470_v33 = vld [vmem:[#allocation9 + $0x20] sm:$0xff]  ;;  %v469_v34 = vld [vmem:[#allocation9 + $0x18] sm:$0xff] }
  0x69   :  { %731 = vmatprep.subr.mxu1 %v1011_v2  ;;  %735 = vmatprep.mubr.msk.f32.mxu1 %vm1012_vm0, %v1011_v2  ;;  %v468_v35 = vld [vmem:[#allocation9 + $0x10] sm:$0xff]  ;;  %v467_v36 = vld [vmem:[#allocation9 + $0x8] sm:$0xff]  ;;  %v466_v37 = vld [vmem:[#allocation9] sm:$0xff] }
  0x6a   :  { %732 = vmatpush3.msra.mxu1 %v381_v8  ;;  %v575_v38 = vld [vmem:[#allocation12 + $0x78] sm:$0xff]  ;;  %v574_v39 = vld [vmem:[#allocation12 + $0x70] sm:$0xff]  ;;  %v573_v40 = vld [vmem:[#allocation12 + $0x68] sm:$0xff] }
  0x6b   :  { %733 = vmatprep.subr.mxu1 %v1011_v2  ;;  %v572_v41 = vld [vmem:[#allocation12 + $0x60] sm:$0xff]  ;;  %v571_v42 = vld [vmem:[#allocation12 + $0x58] sm:$0xff]  ;;  %v570_v43 = vld [vmem:[#allocation12 + $0x50] sm:$0xff] }
  0x6c   :  { %826 = vset.pattern.permute.xlu0 %v1013_v10  ;;  %734 = vmatpush3.msra.mxu1 %v380_v9  ;;  %v569_v44 = vld [vmem:[#allocation12 + $0x48] sm:$0xff]  ;;  %v568_v45 = vld [vmem:[#allocation12 + $0x40] sm:$0xff]  ;;  %v567_v46 = vld [vmem:[#allocation12 + $0x38] sm:$0xff] }
  0x6d   :  { %294 = vperm.xlu0 %826, %v809_v7   ;;  %773 = vmatprep.subr.mxu1 %v1011_v2  ;;  %v566_v47 = vld [vmem:[#allocation12 + $0x30] sm:$0xff]  ;;  %v565_v48 = vld [vmem:[#allocation12 + $0x28] sm:$0xff]  ;;  %v564_v49 = vld [vmem:[#allocation12 + $0x20] sm:$0xff] }
  0x6e   :  { %v563_v50 = vld [vmem:[#allocation12 + $0x18] sm:$0xff]  ;;  %v670_v58 = vld [vmem:[%s1165_s5] ss:$0 sm:$0xff]  ;;  %v561_v0 = vld [vmem:[#allocation12 + $0x8] sm:$0xff] }
  0x6f   :  { %v562_v63 = vld [vmem:[#allocation12 + $0x10] sm:$0xff]  ;;  %v671_v3 = vld [vmem:[#allocation10] ss:$0 sm:$0xff]  ;;  %v672_v8 = vld [vmem:[#allocation13] ss:$0 sm:$0xff] }
  0x71   :  { %828 = vset.pattern.permute.xlu0 %v1010_v1  ;;  %v560_v1 = vld [vmem:[#allocation12] sm:$0xff] }
  0xe3   :  { %v141_v13 = vpop.permute.xlu0 %140  ;;  %v376_v14 = vpop.permute.xlu1 %375 }
  0xe4   :  { %vm142_vm3 = vcmp.eq.s32.totalorder %v138_v12, %v141_v13  ;;  %vm377_vm4 = vcmp.eq.s32.totalorder %v138_v12, %v376_v14 }
  0xe5   :  { %v663_v16 = vsel %vm142_vm3, 1.0, %v1011_v2  ;;  %v668_v17 = vsel %vm377_vm4, 1.0, %v1011_v2 }
  0xe6   :  { %719 = vmatmul.mubr.msk.f32.vlgmr.msra.gmra.mxu0 %vm146_vm1, %v663_v16  ;;  %736 = vmatmul.mubr.msk.f32.vlgmr.msra.gmra.mxu1 %vm382_vm2, %v668_v17 }
  0xe7   :  { %727 = vmatpush3.msra.mxu0 %v299_v15  ;;  %728 = vmatprep.mubr.msk.f32.mxu0 %vm1012_vm0, %v1011_v2 }
  0xe8   :  { %v295_v18 = vpop.permute.xlu0 %294  ;;  %738 = vmatprep.subr.mxu0 %v1011_v2  ;;  %805 = vmatprep.mubr.msk.f32.mxu1 %vm1012_vm0, %v1011_v2 }
  0xe9   :  { %vm296_vm5 = vcmp.eq.s32.totalorder %v138_v12, %v295_v18  ;;  %774 = vmatpush3.msra.mxu1 %v575_v38 }
  0xea   :  { %v666_v20 = vsel %vm296_vm5, 1.0, %v1011_v2  ;;  %775 = vmatprep.subr.mxu1 %v1011_v2 }
  0xeb   :  { %729 = vmatmul.mubr.msk.f32.vlgmr.msra.gmra.mxu0 %vm146_vm1, %v666_v20  ;;  %776 = vmatpush3.msra.mxu1 %v574_v39 }
  0xec   :  { %739 = vmatpush3.msra.mxu0 %v481_v19  ;;  %770 = vmatprep.mubr.msk.f32.mxu0 %vm1012_vm0, %v1011_v2 }
  0xed   :  { %740 = vmatprep.subr.mxu0 %v1011_v2  ;;  %777 = vmatprep.subr.mxu1 %v1011_v2 }
  0xee   :  { %741 = vmatpush3.msra.mxu0 %v480_v21  ;;  %778 = vmatpush3.msra.mxu1 %v573_v40 }
  0xef   :  { %742 = vmatprep.subr.mxu0 %v1011_v2  ;;  %779 = vmatprep.subr.mxu1 %v1011_v2 }
  0xf0   :  { %743 = vmatpush3.msra.mxu0 %v479_v22  ;;  %780 = vmatpush3.msra.mxu1 %v572_v41 }
  0xf1   :  { %744 = vmatprep.subr.mxu0 %v1011_v2  ;;  %781 = vmatprep.subr.mxu1 %v1011_v2 }
  0xf2   :  { %745 = vmatpush3.msra.mxu0 %v478_v23  ;;  %782 = vmatpush3.msra.mxu1 %v571_v42 }
  0xf3   :  { %746 = vmatprep.subr.mxu0 %v1011_v2  ;;  %783 = vmatprep.subr.mxu1 %v1011_v2 }
  0xf4   :  { %747 = vmatpush3.msra.mxu0 %v477_v24  ;;  %784 = vmatpush3.msra.mxu1 %v570_v43 }
  0xf5   :  { %748 = vmatprep.subr.mxu0 %v1011_v2  ;;  %785 = vmatprep.subr.mxu1 %v1011_v2 }
  0xf6   :  { %749 = vmatpush3.msra.mxu0 %v476_v25  ;;  %786 = vmatpush3.msra.mxu1 %v569_v44 }
  0xf7   :  { %750 = vmatprep.subr.mxu0 %v1011_v2  ;;  %787 = vmatprep.subr.mxu1 %v1011_v2 }
  0xf8   :  { %751 = vmatpush3.msra.mxu0 %v475_v26  ;;  %788 = vmatpush3.msra.mxu1 %v568_v45 }
  0xf9   :  { %752 = vmatprep.subr.mxu0 %v1011_v2  ;;  %789 = vmatprep.subr.mxu1 %v1011_v2 }
  0xfa   :  { %753 = vmatpush3.msra.mxu0 %v474_v27  ;;  %790 = vmatpush3.msra.mxu1 %v567_v46 }
  0xfb   :  { %754 = vmatprep.subr.mxu0 %v1011_v2  ;;  %791 = vmatprep.subr.mxu1 %v1011_v2 }
  0xfc   :  { %755 = vmatpush3.msra.mxu0 %v473_v28  ;;  %792 = vmatpush3.msra.mxu1 %v566_v47 }
  0xfd   :  { %756 = vmatprep.subr.mxu0 %v1011_v2  ;;  %793 = vmatprep.subr.mxu1 %v1011_v2 }
  0xfe   :  { %757 = vmatpush3.msra.mxu0 %v472_v29  ;;  %794 = vmatpush3.msra.mxu1 %v565_v48 }
  0xff   :  { %758 = vmatprep.subr.mxu0 %v1011_v2  ;;  %795 = vmatprep.subr.mxu1 %v1011_v2 }
 0x100   :  { %759 = vmatpush3.msra.mxu0 %v471_v31  ;;  %796 = vmatpush3.msra.mxu1 %v564_v49 }
 0x101   :  { %760 = vmatprep.subr.mxu0 %v1011_v2  ;;  %797 = vmatprep.subr.mxu1 %v1011_v2 }
 0x102   :  { %761 = vmatpush3.msra.mxu0 %v470_v33  ;;  %798 = vmatpush3.msra.mxu1 %v563_v50 }
 0x103   :  { %762 = vmatprep.subr.mxu0 %v1011_v2  ;;  %799 = vmatprep.subr.mxu1 %v1011_v2 }
 0x104   :  { %763 = vmatpush3.msra.mxu0 %v469_v34  ;;  %800 = vmatpush3.msra.mxu1 %v562_v63 }
 0x105   :  { %764 = vmatprep.subr.mxu0 %v1011_v2  ;;  %801 = vmatprep.subr.mxu1 %v1011_v2 }
 0x106   :  { %765 = vmatpush3.msra.mxu0 %v468_v35  ;;  %802 = vmatpush3.msra.mxu1 %v561_v0 }
 0x107   :  { %766 = vmatprep.subr.mxu0 %v1011_v2  ;;  %803 = vmatprep.subr.mxu1 %v1011_v2 }
 0x108   :  { %767 = vmatpush3.msra.mxu0 %v467_v36  ;;  %804 = vmatpush3.msra.mxu1 %v560_v1 }
 0x109   :  { %768 = vmatprep.subr.mxu0 %v1011_v2 }
 0x10a   :  { %769 = vmatpush3.msra.mxu0 %v466_v37 }
 0x127   :  { %v1130_v30 = vpop.f32.mrf.mxu1 }
 0x129   :  { %v725_v32 = vpop.f32.mrf.mxu1 }
 0x1a6   :  { %v216_v51 = vpop.f32.mrf.mxu0  ;;  %v452_v52 = vpop.f32.mrf.mxu1 }
 0x1a7   :  { %v290_v55 = vadd.f32 %v1130_v30, %v216_v51 }
 0x1a8   :  { %v720_v53 = vpop.f32.mrf.mxu0  ;;  %v737_v54 = vpop.f32.mrf.mxu1 }
 0x1ab   :  { %v369_v56 = vpop.f32.mrf.mxu0 }
 0x1ac   :  { %v373_v57 = vadd.f32 %v369_v56, %v290_v55 }
 0x1ad   :  { %v730_v59 = vpop.f32.mrf.mxu0 }
 0x1ae   :  { %v456_v60 = vadd.f32 %v452_v52, %v373_v57 }
 0x1b0   :  { %v464_v61 = vadd.f32 %v670_v58, %v456_v60 }
 0x1b2   :  { %v465_v62 = vmax.f32 %v464_v61, 0.0 }
 0x1b4   :  { %771 = vmatmul.mubr.f32.vlgmr.msra.gmra.mxu0 %v465_v62 }
 0x274   :  { %v555_v4 = vpop.f32.mrf.mxu0 }
 0x275   :  { %v556_v5 = vadd.f32 %v671_v3, %v555_v4 }
 0x276   :  { %v772_v6 = vpop.f32.mrf.mxu0 }
 0x277   :  { %v559_v7 = vmax.f32 %v556_v5, 0.0 }
 0x279   :  { %806 = vmatmul.mubr.f32.vlgmr.msra.gmra.mxu1 %v559_v7 }
 0x339   :  { %v649_v9 = vpop.f32.mrf.mxu1 }
 0x33a   :  { %v650_v10 = vadd.f32 %v672_v8, %v649_v9 }
 0x33b   :  { %v807_v11 = vpop.f32.mrf.mxu1 }
 0x33c   :  { %653 = vst [vmem:[%s1170_s10] sm:$0xff] %v650_v10 }
 0x33d   :  { %658 = vsyncpa [#allocation3], 1 }
 0x33e   :  { %659 = vsyncpa [#allocation5], 1 }
 0x33f   :  { %660 = vsyncpa [#allocation8], 1 }
 0x340   :  { %661 = vsyncpa [#allocation11], 1 }
 0x341   :  { %662 = vsyncpa [#allocation14], 1 }

</bundles_post_ra>
